<compile_context>
chip_gen: v6e
topology: v6e:2x2x1
jax: 0.10.0
libtpu: 0.0.40
codegen_flags: <defaults>
</compile_context>

<pallas_src>
import jax
import jax.numpy as jnp
from jax.experimental import pallas as pl
from jax.experimental.pallas import tpu as pltpu


_OUT_SUB = 8      # sublanes in each tile's output slab
_OUT_LANE = 128   # lanes in each tile's output slab


def _make_entropy_kernel(batch: int, tile_rows: int, needs_mask: bool):
    """Per-tile kernel: sum over valid rows of sum_j p_j * log p_j."""

    def kernel(x_ref, o_ref):
        i = pl.program_id(0)

        # [TB, C] tile; compute in f32 in VMEM regardless of HBM dtype.
        x = x_ref[...].astype(jnp.float32)
        m = jnp.max(x, axis=-1, keepdims=True)                   # [TB, 1]
        shifted = x - m
        e = jnp.exp(shifted)                                      # EUP
        s = jnp.sum(e, axis=-1, keepdims=True)                    # [TB, 1]
        row_dot = jnp.sum(e * shifted, axis=-1, keepdims=True)    # [TB, 1]
        # Per-row sum_j p_j * log p_j == row_dot / s - log(s); exact divide,
        # but only TB of them per tile.
        row_ent = row_dot / s - jnp.log(s)                        # [TB, 1]

        if needs_mask:
            # Ragged last block: Pallas pads with unspecified values. SELECT
            # (not multiply) the garbage rows away after row_ent is computed.
            row_ids = i * tile_rows + jax.lax.broadcasted_iota(
                jnp.int32, row_ent.shape, 0)
            row_ent = jnp.where(row_ids < batch, row_ent, 0.0)

        partial = jnp.sum(row_ent, axis=0, keepdims=True)         # (1, 1)

        # Lane-dense (8,128) per-tile output slab: partial at [0,0], zeros
        # elsewhere, so the wrapper can tree-sum the whole output array.
        rr = jax.lax.broadcasted_iota(jnp.int32, (_OUT_SUB, _OUT_LANE), 0)
        cc = jax.lax.broadcasted_iota(jnp.int32, (_OUT_SUB, _OUT_LANE), 1)
        o_ref[...] = jnp.where((rr == 0) & (cc == 0), partial, 0.0)

    return kernel


def _choose_tile_rows(B: int, C: int, itemsize: int,
                      target_tile_bytes: int = 2 << 20) -> int:
    """Pick a batch tile by bytes (~2 MiB raw input per step), multiple of 8."""
    row_bytes = max(1, C * itemsize)
    rows = target_tile_bytes // row_bytes
    if rows >= B:
        return B                       # single full-dim block is always legal
    return max(8, int(rows // 8) * 8)  # multiple of 8 sublanes


def penalized_confidence_entropy(preds: jax.Array, beta: float = 0.1,
                                 block_rows: int | None = None) -> jax.Array:
    """Pallas TPU implementation of PenalizedConfidenceEntropy.forward."""
    assert preds.ndim == 2, "preds must be [B, C]"
    B, C = preds.shape
    itemsize = preds.dtype.itemsize

    if block_rows is None:
        tb = _choose_tile_rows(B, C, itemsize)
    else:
        tb = min(int(block_rows), B)
        if tb < B:
            tb = max(8, (tb // 8) * 8)

    num_tiles = pl.cdiv(B, tb)
    needs_mask = (num_tiles * tb) != B

    kernel = _make_entropy_kernel(B, tb, needs_mask)

    # VMEM budget: double-buffered input tile + ~4 f32 temporaries the body
    # creates (cast, shifted, e, e*shifted) + slack. Clamp to stay inside
    # v7x's 64 MiB physical VMEM while allowing large tiles on v5e/v6e.
    in_tile_bytes = tb * C * itemsize
    f32_tmp_bytes = 4 * tb * C * 4
    vmem_limit = int(min(max(2 * in_tile_bytes + f32_tmp_bytes + (2 << 20),
                             32 << 20), 48 << 20))

    cost = pl.CostEstimate(
        flops=5 * B * C,                         # sub, mul, max/add reductions
        transcendentals=B * C + 2 * B,           # exp per element, log/div per row
        bytes_accessed=B * C * itemsize + num_tiles * _OUT_SUB * _OUT_LANE * 4,
    )

    partials = pl.pallas_call(
        kernel,
        out_shape=jax.ShapeDtypeStruct((num_tiles * _OUT_SUB, _OUT_LANE),
                                       jnp.float32),
        grid_spec=pltpu.PrefetchScalarGridSpec(
            num_scalar_prefetch=0,
            grid=(num_tiles,),
            in_specs=[pl.BlockSpec((tb, C), lambda i: (i, 0))],
            out_specs=pl.BlockSpec((_OUT_SUB, _OUT_LANE), lambda i: (i, 0)),
        ),
        compiler_params=pltpu.CompilerParams(
            dimension_semantics=("parallel",),   # no cross-step carry; v7x 2 TCs
            vmem_limit_bytes=vmem_limit,
        ),
        cost_estimate=cost,
    )(preds)

    # Final scale + scalar collapse in the wrapper (num_tiles*8*128 floats).
    total = jnp.sum(partials, dtype=jnp.float32)
    return total * jnp.float32(-float(beta) / float(B))


def _reference(preds: jax.Array, beta: float = 0.1) -> jax.Array:
    # Plain-JAX reference mirroring the PyTorch code (compute in f32).
    B = preds.shape[0]
    x = preds.astype(jnp.float32)
    probs = jax.nn.softmax(x, axis=-1)
    logprobs = jax.nn.log_softmax(x, axis=-1)
    out = -1.0 * beta * logprobs.reshape(-1) * probs.reshape(-1)
    return jnp.sum(out) / B


if __name__ == "__main__":
    key = jax.random.PRNGKey(0)

    # Small [batch, num_classes] logits, matching the module's B*C input.
    B, C = 8, 32
    preds = jax.random.normal(key, (B, C), dtype=jnp.float32)
    out = jax.block_until_ready(penalized_confidence_entropy(preds, beta=0.1))
    ref = _reference(preds, beta=0.1)
    assert jnp.allclose(out, ref, atol=1e-5, rtol=1e-5), (out, ref)

    # Tiled + ragged path (B > tile, B not a tile multiple) -> in-kernel mask.
    B2, C2 = 70, 128
    preds2 = jax.random.normal(jax.random.PRNGKey(1), (B2, C2), dtype=jnp.float32)
    out2 = jax.block_until_ready(
        penalized_confidence_entropy(preds2, beta=0.1, block_rows=32))
    ref2 = _reference(preds2, beta=0.1)
    assert jnp.allclose(out2, ref2, atol=1e-5, rtol=1e-5), (out2, ref2)

    # bf16 input accepted end-to-end (upcast to f32 happens on the VMEM tile).
    B3, C3 = 16, 256
    preds3 = jax.random.normal(jax.random.PRNGKey(2), (B3, C3), dtype=jnp.bfloat16)
    out3 = jax.block_until_ready(penalized_confidence_entropy(preds3, beta=0.1))
    ref3 = _reference(preds3, beta=0.1)
    assert jnp.allclose(out3, ref3, atol=1e-5, rtol=1e-5), (out3, ref3)

    print("KERNEL_OK")
</pallas_src>

<mosaic_0001>
module attributes {stable_mosaic.version = 11 : i64} {
  func.func @kernel(%arg0: i32, %arg1: memref<8x32xf32, #tpu.memory_space<vmem>>, %arg2: memref<8x128xf32, #tpu.memory_space<vmem>>) attributes {dimension_semantics = [#tpu.dimension_semantics<parallel>], iteration_bounds = array<i64: 1>, scalar_prefetch = 0 : i64, scratch_operands = 0 : i64, tpu.core_type = #tpu.core_type<tc>, window_params = [{transform_indices = @transform_0, window_bounds = array<i64: 8, 32>}, {transform_indices = @transform_1, window_bounds = array<i64: 8, 128>}]} {
    %c0 = arith.constant 0 : index
    %c0_0 = arith.constant 0 : index
    %0 = vector.load %arg1[%c0, %c0_0] : memref<8x32xf32, #tpu.memory_space<vmem>>, vector<8x32xf32>
    %cst = arith.constant dense<0xFF800000> : vector<8xf32>
    %1 = vector.multi_reduction <maximumf>, %0, %cst [1] : vector<8x32xf32> to vector<8xf32>
    %2 = vector.shape_cast %1 : vector<8xf32> to vector<8x1xf32>
    %3 = vector.broadcast %2 : vector<8x1xf32> to vector<8x32xf32>
    %4 = arith.subf %0, %3 : vector<8x32xf32>
    %5 = math.exp %4 : vector<8x32xf32>
    %cst_1 = arith.constant dense<0.000000e+00> : vector<8xf32>
    %6 = vector.multi_reduction <add>, %5, %cst_1 [1] : vector<8x32xf32> to vector<8xf32>
    %7 = vector.shape_cast %6 : vector<8xf32> to vector<8x1xf32>
    %8 = arith.mulf %5, %4 : vector<8x32xf32>
    %cst_2 = arith.constant dense<0.000000e+00> : vector<8xf32>
    %9 = vector.multi_reduction <add>, %8, %cst_2 [1] : vector<8x32xf32> to vector<8xf32>
    %10 = vector.shape_cast %9 : vector<8xf32> to vector<8x1xf32>
    %11 = arith.divf %10, %7 : vector<8x1xf32>
    %12 = math.log %7 : vector<8x1xf32>
    %13 = arith.subf %11, %12 : vector<8x1xf32>
    %cst_3 = arith.constant dense<0.000000e+00> : vector<1xf32>
    %14 = vector.multi_reduction <add>, %13, %cst_3 [0] : vector<8x1xf32> to vector<1xf32>
    %15 = vector.shape_cast %14 : vector<1xf32> to vector<1x1xf32>
    %16 = tpu.iota {dimensions = array<i32: 0>} : vector<8x128xi32>
    %17 = tpu.iota {dimensions = array<i32: 1>} : vector<8x128xi32>
    %c0_i32 = arith.constant 0 : i32
    %18 = vector.broadcast %c0_i32 : i32 to vector<8x128xi32>
    %19 = arith.cmpi eq, %16, %18 : vector<8x128xi32>
    %c0_i32_4 = arith.constant 0 : i32
    %20 = vector.broadcast %c0_i32_4 : i32 to vector<8x128xi32>
    %21 = arith.cmpi eq, %17, %20 : vector<8x128xi32>
    %22 = arith.andi %19, %21 : vector<8x128xi1>
    %cst_5 = arith.constant 0.000000e+00 : f32
    %23 = vector.shape_cast %15 : vector<1x1xf32> to vector<1x1xf32>
    %24 = vector.broadcast %23 : vector<1x1xf32> to vector<8x128xf32>
    %25 = vector.broadcast %cst_5 : f32 to vector<8x128xf32>
    %26 = arith.select %22, %24, %25 : vector<8x128xi1>, vector<8x128xf32>
    %c0_6 = arith.constant 0 : index
    %c0_7 = arith.constant 0 : index
    %27 = vector.load %arg2[%c0_6, %c0_7] : memref<8x128xf32, #tpu.memory_space<vmem>>, vector<8x128xf32>
    tpu.vector_store %arg2[%c0_6, %c0_7], %26 {strides = array<i32>} : memref<8x128xf32, #tpu.memory_space<vmem>>, vector<8x128xf32>,
    return
  }
  func.func @transform_0(%arg0: i32) -> (i32, i32) {
    %c0_i32 = arith.constant 0 : i32
    %c0_i32_0 = arith.constant 0 : i32
    return %arg0, %c0_i32 : i32, i32
  }
  func.func @transform_1(%arg0: i32) -> (i32, i32) {
    %c0_i32 = arith.constant 0 : i32
    %c0_i32_0 = arith.constant 0 : i32
    return %arg0, %c0_i32 : i32, i32
  }
}

</mosaic_0001>

<bundles_post_ra>
// kernel: tpu_custom_call.1
= control target key start
LH: loop header
LB: loop body
LE: loop exit
PB: predicated region body
PF: predicated region fallthrough
CT: control target
= control target key end

     0   :  { %6 = vsyncpa [#allocation3], 0  ;;  %s141_s0 = inlined_call_operand.hbm [shape: f32[8,32], index: 0, kind: input, shape index: {}]   ;;  %s142_s1 = inlined_call_operand.hbm [shape: f32[8,128], index: 1, kind: output, shape index: {}]  }
   0x1   :  { %7 = vsyncpa [#allocation4], 0  ;;  %s123_s6 = smov [#allocation2]  }
   0x2   :  { %s14_s7 = sshll.u32 %s123_s6, 4  ;;  %s15_s7 = int_to_ptr.vmem [resolvable:$true] %s14_s7 }
   0x3   :  { %s87_s8 = scalar_lea.vmem %s15_s7, 128  ;;  %p92_p1 = scmp.lt.s32.totalorder %s15_s7, %s15_s7 }
   0x4   :  { %p88_p0 = scmp.ne.s32.totalorder %s15_s7, %s87_s8  ;;  %p93_p2 = scmp.lt.s32.totalorder %s87_s8, %s87_s8 }
   0x6   :  { %p94_p3 = por %p93_p2, %p92_p1 }
   0x8   :  { %p95_p4 = pnand %p94_p3, %p88_p0 }
   0xa   :  { %98 = shalt.err (!%p95_p4)
}
   0xb   :  { %17 = dma.hbm_to_vmem [thread:$0]  %s141_s0, 128, %s15_s7, [#allocation3]  }
   0xc   :  { %119 = dma.done.wait [#allocation3], 128  }
   0xd   :  { %120 = vsyncadd [#allocation3], 4294967168  ;;  %vm22_vm0 = vcmask 261120   ;;  %v21_v0 = vld [vmem:[#allocation2] sm:$0xff]  ;;  %v47_v16 = vlaneseq  ;;  %s124_s0 = smov [#allocation5]  }
   0xe   :  { %v23_v1 = vsel %vm22_vm0, %v21_v0, -inf  ;;  %s62_s11 = sshll.u32 %s124_s0, 4  ;;  %s63_s11 = int_to_ptr.vmem [resolvable:$true] %s62_s11 }
   0xf   :  { %24 = vmax.xlane.f32.xlu0 %v23_v1  ;;  %v48_v19 = vshrl.u32 %v47_v16, 7  ;;  %v50_v20 = vand.u32 127, %v47_v16  ;;  %s99_s12 = scalar_lea.vmem %s63_s11, 128  ;;  %p104_p6 = scmp.lt.s32.totalorder %s63_s11, %s63_s11 }
  0x10   :  { %p100_p5 = scmp.ne.s32.totalorder %s63_s11, %s99_s12  ;;  %p105_p7 = scmp.lt.s32.totalorder %s99_s12, %s99_s12 }
  0x11   :  { %vm51_vm1 = vcmp.eq.s32.totalorder %v48_v19, 0  ;;  %vm52_vm2 = vcmp.eq.s32.totalorder %v50_v20, 0 }
  0x12   :  { %vm53_vm3 = vmand %vm51_vm1, %vm52_vm2  ;;  %p106_p8 = por %p105_p7, %p104_p6 }
  0x14   :  { %p107_p9 = pnand %p106_p8, %p100_p5 }
  0x98   :  { %v25_v2 = vpop.xlane.xlu0 %24 }
  0x99   :  { %v26_v3 = vsub.f32 %v21_v0, %v25_v2 }
  0x9b   :  { %v27_v4 = vmul.f32 1.442695, %v26_v3 }
  0x9d   :  { %73 = vpow2.f32 %v27_v4 }
  0xaa   :  { %v74_v5 = vpop.eup %73 }
  0xab   :  { %v29_v6 = vsel %vm22_vm0, %v74_v5, 0.0  ;;  %v32_v7 = vmul.f32 %v74_v5, %v26_v3 }
  0xac   :  { %30 = vadd.xlane.f32.xlu0 %v29_v6 }
  0xad   :  { %v33_v8 = vsel %vm22_vm0, %v32_v7, 0.0 }
  0xae   :  { %34 = vadd.xlane.f32.xlu1 %v33_v8 }
 0x135   :  { %v31_v9 = vpop.xlane.xlu0 %30 }
 0x136   :  { %75 = vrcp.f32 %v31_v9 }
 0x137   :  { %77 = vlog2.f32 %v31_v9  ;;  %v35_v11 = vpop.xlane.xlu1 %34 }
 0x143   :  { %v76_v10 = vpop.eup %75 }
 0x144   :  { %v78_v12 = vpop.eup %77  ;;  %v37_v13 = vmul.f32 %v76_v10, %v35_v11 }
 0x145   :  { %v39_v14 = vmul.f32 0.6931472, %v78_v12 }
 0x147   :  { %v40_v15 = vsub.f32 %v37_v13, %v39_v14 }
 0x149   :  { %v41_v17 = vrot.slane %v40_v15, 4 }
 0x14b   :  { %v42_v18 = vadd.f32 %v41_v17, %v40_v15 }
 0x14d   :  { %v43_v21 = vrot.slane %v42_v18, 2 }
 0x14f   :  { %v44_v22 = vadd.f32 %v43_v21, %v42_v18 }
 0x151   :  { %v45_v23 = vrot.slane %v44_v22, 1 }
 0x153   :  { %v46_v24 = vadd.f32 %v45_v23, %v44_v22 }
 0x155   :  { %v54_v25 = vsel %vm53_vm3, %v46_v24, 0.0 }
 0x156   :  { %55 = vst [vmem:[#allocation5] sm:$0xff] %v54_v25 }
 0x157   :  { %110 = shalt.err (!%p107_p9)
}
 0x158   :  { %65 = dma.vmem_to_hbm [thread:$0]  %s63_s11, 128, %s142_s1, [#allocation4]  }
 0x159   :  { %121 = dma.done.wait [#allocation4], 128  }
 0x15a   :  { %122 = vsyncadd [#allocation4], 4294967168 }
 0x15b   :  { %69 = vsyncpa [#allocation3], 1 }
 0x15c   :  { %70 = vsyncpa [#allocation4], 1 }

</bundles_post_ra>
